<compile_context>
chip_gen: v7x
topology: tpu7x:2x2x1
jax: 0.10.0
libtpu: 0.0.40
codegen_flags: <defaults>
</compile_context>

<pallas_src>
import functools

import jax
import jax.numpy as jnp
from jax.experimental import pallas as pl
from jax.experimental.pallas import tpu as pltpu

_TM_MAX = 512
_LANE = 128


def _round_up(x, m):
    return (x + m - 1) // m * m


@functools.lru_cache(maxsize=1)
def _vmem_budget_bytes():
    """Generation-aware scoped-VMEM budget (v5e/v6e: 128 MiB phys, v7x: 64 MiB)."""
    try:
        info = pltpu.get_tpu_info()
        cap = int(getattr(info, "vmem_capacity_bytes", 0))
        if cap > 0:
            return max(16 * 1024 * 1024, (cap * 3) // 4)
    except Exception:
        pass
    return 32 * 1024 * 1024


def _pick_tm(mp, kp, cout, budget, prefer_two, resident_bytes=0):
    """Largest row-tile that is a multiple of 8, divides `mp` and fits VMEM."""
    per_row = 2 * kp * 2 + 2 * cout * 4          # dbl-buffered bf16 patches + output
    fixed = kp * cout * 2 + resident_bytes       # weights + resident blocks
    avail = max(budget - fixed, 8 * per_row)
    tmax = max(8, min(_TM_MAX, avail // per_row))
    tmax -= tmax % 8
    hi = mp // 2 if (prefer_two and mp >= 16) else mp   # >=2 tiles for pipelining
    hi = min(max(8, hi - hi % 8), tmax)
    for d in range(hi, 7, -8):
        if mp % d == 0:
            return d
    return 8   # mp is always a multiple of 8


# ----------------------------------------------------------------------------
# Pallas kernels
# ----------------------------------------------------------------------------
def _conv_act_kernel(p_ref, w_ref, b_ref, o_ref, *, slope):
    """Streaming im2col conv: patches-tile @ weights + bias (+ LeakyReLU), bf16 out."""
    acc = jnp.dot(p_ref[...], w_ref[...], preferred_element_type=jnp.float32)
    acc = acc + b_ref[...]                       # (1, Cout) broadcast over rows
    if slope is not None:
        acc = jnp.where(acc >= 0, acc, slope * acc)
    o_ref[...] = acc.astype(o_ref.dtype)


def _conv_norm_act_kernel(p_ref, w_ref, o_ref, acc_ref, sum_ref, *,
                          eps, slope, p_valid, p_total, tm):
    """Conv matmul with fused InstanceNorm(affine=False) + LeakyReLU.

    Grid = (N, n_spatial_tiles).  Per sample, the conv output accumulates into a
    resident f32 VMEM scratch across spatial tiles while a (1, Cout) running sum
    is streamed; the final tile finalizes mean, computes a two-pass (centered)
    variance, normalizes, applies LeakyReLU and writes the bf16 feature map to
    HBM exactly once.  No bias (cancelled exactly by the normalization).
    """
    t = pl.program_id(1)

    @pl.when(t == 0)
    def _():
        sum_ref[...] = jnp.zeros_like(sum_ref)

    acc = jnp.dot(p_ref[...], w_ref[...], preferred_element_type=jnp.float32)
    acc_ref[pl.ds(pl.multiple_of(t * tm, tm), tm), :] = acc
    # streamed per-channel sum: rides on data already in vregs (padded patch rows
    # are zero and contribute nothing since there is no bias).
    sum_ref[...] += jnp.sum(acc, axis=0, keepdims=True)

    @pl.when(t == pl.num_programs(1) - 1)
    def _():
        inv_n = 1.0 / float(p_valid)
        mean = sum_ref[...] * inv_n                       # (1, Cout)
        y = acc_ref[...]                                  # (Pp, Cout) f32, resident
        d = y - mean                                      # two-pass variance
        if p_valid < p_total:                             # mask padded rows (static)
            row = jax.lax.broadcasted_iota(jnp.int32, d.shape, 0)
            dm = jnp.where(row < p_valid, d, 0.0)
        else:
            dm = d
        var = jnp.sum(dm * dm, axis=0, keepdims=True) * inv_n
        z = d * jax.lax.rsqrt(var + eps)
        o_ref[...] = jnp.where(z >= 0, z, slope * z).astype(o_ref.dtype)


# ----------------------------------------------------------------------------
# im2col glue (plain JAX) + weight packing
# ----------------------------------------------------------------------------
def _im2col(x_nhwc, kh, kw, stride, padding):
    """bf16 patches (N, Ho*Wo, Kp) in [ky][kx][cin] order; K zero-padded to 128
    inside the concatenate (no second full-size pad copy)."""
    x = x_nhwc.astype(jnp.bfloat16)
    N, H, W, Cin = x.shape
    xp = jnp.pad(x, ((0, 0), (padding, padding), (padding, padding), (0, 0)))
    Ho = (H + 2 * padding - kh) // stride + 1
    Wo = (W + 2 * padding - kw) // stride + 1
    cols = [xp[:, ky:ky + stride * Ho:stride, kx:kx + stride * Wo:stride, :]
            for ky in range(kh) for kx in range(kw)]
    K = kh * kw * Cin
    Kp = _round_up(K, _LANE)
    if Kp > K:
        cols.append(jnp.zeros((N, Ho, Wo, Kp - K), jnp.bfloat16))
    patches = jnp.concatenate(cols, axis=-1).reshape(N, Ho * Wo, Kp)
    return patches, Ho, Wo, Kp


def _pack_weight(w, k_pad, cout_pad=None):
    """PyTorch (Cout, Cin, kh, kw) -> bf16 (Kp, Cout_pad) matching [ky][kx][cin]."""
    Cout, Cin, kh, kw = w.shape
    K = kh * kw * Cin
    w2 = jnp.transpose(w, (2, 3, 1, 0)).reshape(K, Cout)
    cp = cout_pad or Cout
    return jnp.pad(w2, ((0, k_pad - K), (0, cp - Cout))).astype(jnp.bfloat16)


# ----------------------------------------------------------------------------
# Pallas wrappers
# ----------------------------------------------------------------------------
def conv2d_act_pallas(x_nhwc, w, b, stride, padding, slope=None, lane_pad_out=False):
    """Conv2d (+ optional LeakyReLU), streaming over M-tiles, bf16 output."""
    Cout, Cin, kh, kw = w.shape
    patches, Ho, Wo, Kp = _im2col(x_nhwc, kh, kw, stride, padding)
    N = x_nhwc.shape[0]
    M = N * Ho * Wo

    # Lane-dense output for the tiny-Cout head: pad weight columns to 128 lanes so
    # stores are unmasked; the extra (zero) columns are sliced off afterwards.
    Cp = _LANE if (lane_pad_out and Cout < _LANE) else Cout

    Mp = _round_up(M, 8)
    p2 = patches.reshape(M, Kp)
    if Mp > M:                                   # only pad rows when required
        p2 = jnp.pad(p2, ((0, Mp - M), (0, 0)))

    budget = _vmem_budget_bytes()
    tm = _pick_tm(Mp, Kp, Cp, budget, prefer_two=True)

    w2 = _pack_weight(w, Kp, cout_pad=Cp)
    bias = jnp.pad(b.reshape(1, Cout), ((0, 0), (0, Cp - Cout))).astype(jnp.float32)

    cost = pl.CostEstimate(
        flops=2 * Mp * Kp * Cp,
        transcendentals=0,
        bytes_accessed=Mp * Kp * 2 + Kp * Cp * 2 + Mp * Cp * 2)

    out = pl.pallas_call(
        functools.partial(_conv_act_kernel, slope=slope),
        out_shape=jax.ShapeDtypeStruct((Mp, Cp), jnp.bfloat16),
        grid=(Mp // tm,),
        in_specs=[
            pl.BlockSpec((tm, Kp), lambda i: (i, 0)),
            pl.BlockSpec((Kp, Cp), lambda i: (0, 0)),
            pl.BlockSpec((1, Cp), lambda i: (0, 0)),
        ],
        out_specs=pl.BlockSpec((tm, Cp), lambda i: (i, 0)),
        compiler_params=pltpu.CompilerParams(
            dimension_semantics=("parallel",),
            vmem_limit_bytes=budget),
        cost_estimate=cost,
    )(p2, w2, bias)
    return out[:M, :Cout].reshape(N, Ho, Wo, Cout)


def conv2d_instnorm_leaky_pallas(x_nhwc, w, stride, padding, eps=1e-5, slope=0.2):
    """Conv2d + InstanceNorm2d(affine=False) + LeakyReLU(0.2), fully fused.

    Bias is intentionally not applied: a per-channel constant is exactly
    cancelled by the instance normalization (zero numerical change)."""
    Cout, Cin, kh, kw = w.shape
    patches, Ho, Wo, Kp = _im2col(x_nhwc, kh, kw, stride, padding)
    N = x_nhwc.shape[0]
    P = Ho * Wo
    Pp = _round_up(P, 8)
    if Pp > P:                                   # rare, only tiny late layers
        patches = jnp.pad(patches, ((0, 0), (0, Pp - P), (0, 0)))

    budget = _vmem_budget_bytes()
    resident = Pp * Cout * (4 + 2)               # f32 scratch + bf16 output block
    tm = _pick_tm(Pp, Kp, Cout, budget, prefer_two=False, resident_bytes=resident)
    # TODO(synk): if `resident` alone exceeds the VMEM budget (very large feature
    # maps on v7x), fall back to an un-fused conv + separate two-pass norm kernel.

    w2 = _pack_weight(w, Kp)

    cost = pl.CostEstimate(
        flops=2 * N * Pp * Kp * Cout + 8 * N * Pp * Cout,
        transcendentals=N * Cout,
        bytes_accessed=N * Pp * Kp * 2 + Kp * Cout * 2 + N * Pp * Cout * 2)

    out = pl.pallas_call(
        functools.partial(_conv_norm_act_kernel, eps=eps, slope=slope,
                          p_valid=P, p_total=Pp, tm=tm),
        out_shape=jax.ShapeDtypeStruct((N, Pp, Cout), jnp.bfloat16),
        grid=(N, Pp // tm),
        in_specs=[
            pl.BlockSpec((None, tm, Kp), lambda n, t: (n, t, 0)),
            pl.BlockSpec((Kp, Cout), lambda n, t: (0, 0)),
        ],
        # output block index ignores t -> written to HBM once, after the last tile
        out_specs=pl.BlockSpec((None, Pp, Cout), lambda n, t: (n, 0, 0)),
        scratch_shapes=[pltpu.VMEM((Pp, Cout), jnp.float32),   # resident f32 acc
                        pltpu.VMEM((1, Cout), jnp.float32)],   # streamed channel sum
        compiler_params=pltpu.CompilerParams(
            dimension_semantics=("parallel", "arbitrary"),
            vmem_limit_bytes=budget),
        cost_estimate=cost,
    )(patches, w2)
    return out[:, :P, :].reshape(N, Ho, Wo, Cout)


# ----------------------------------------------------------------------------
# Parameter construction (deterministic, synthetic -- mirrors __init__ shapes)
# ----------------------------------------------------------------------------
def init_params(key, input_nc=4, ndf=8, n_layers=3, kw=4):
    def conv_init(k, cin, cout):
        k1, k2 = jax.random.split(k)
        bound = 1.0 / (cin * kw * kw) ** 0.5
        w = jax.random.uniform(k1, (cout, cin, kw, kw), jnp.float32, -bound, bound)
        b = jax.random.uniform(k2, (cout,), jnp.float32, -bound, bound)
        return w, b

    keys = jax.random.split(key, n_layers + 2)
    params = []
    w, b = conv_init(keys[0], input_nc, ndf)                 # block_0: conv + LeakyReLU
    params.append(dict(w=w, b=b, stride=2, pad=1, norm=False))
    nf_mult = 1
    for n in range(1, n_layers):
        nf_prev, nf_mult = nf_mult, min(2 ** n, 8)
        w, b = conv_init(keys[n], ndf * nf_prev, ndf * nf_mult)
        params.append(dict(w=w, b=b, stride=2, pad=1, norm=True))
    nf_prev, nf_mult = nf_mult, min(2 ** n_layers, 8)
    w, b = conv_init(keys[n_layers], ndf * nf_prev, ndf * nf_mult)
    params.append(dict(w=w, b=b, stride=1, pad=1, norm=True))
    w, b = conv_init(keys[n_layers + 1], ndf * nf_mult, 1)   # final: conv -> 1 channel
    params.append(dict(w=w, b=b, stride=1, pad=1, norm=False))
    return params


# ----------------------------------------------------------------------------
# Forward (matches NLayerDiscriminator.forward, noise_annealer=None)
# ----------------------------------------------------------------------------
def _nearest_resize_nchw(x, out_hw):
    # F.interpolate(mode='nearest'): src = floor(dst * in / out)
    N, C, Hin, Win = x.shape
    Ho, Wo = out_hw
    hi = (jnp.arange(Ho) * Hin // Ho).astype(jnp.int32)
    wi = (jnp.arange(Wo) * Win // Wo).astype(jnp.int32)
    return x[:, :, hi[:, None], wi[None, :]]


def n_layer_discriminator_forward(params, im, x, requires_features=False):
    # im, x: NCHW float32
    if x.shape != im.shape:
        x = _nearest_resize_nchw(x, im.shape[2:])
    h = jnp.transpose(jnp.concatenate([x, im], axis=1), (0, 2, 3, 1))  # -> NHWC
    feats = []
    last = len(params) - 1
    for i, p in enumerate(params):
        if p["norm"]:
            h = conv2d_instnorm_leaky_pallas(h, p["w"], p["stride"], p["pad"])
        else:
            slope = 0.2 if i == 0 else None      # block_0 has LeakyReLU; final block none
            h = conv2d_act_pallas(h, p["w"], p["b"], p["stride"], p["pad"],
                                  slope=slope, lane_pad_out=(i == last))
        if requires_features:
            feats.append(h)
    if requires_features:
        return [jnp.transpose(f, (0, 3, 1, 2)).astype(jnp.float32) for f in feats]
    return jnp.transpose(h, (0, 3, 1, 2)).astype(jnp.float32)


# ----------------------------------------------------------------------------
if __name__ == "__main__":
    key = jax.random.PRNGKey(0)
    k_im, k_x, k_p = jax.random.split(key, 3)

    # small but valid shapes: 5 conv blocks (k=4) need >= 32 spatial to stay > 0
    N, C_each, S = 2, 2, 32
    im = jax.random.normal(k_im, (N, C_each, S, S), jnp.float32)
    x = jax.random.normal(k_x, (N, C_each, S, S), jnp.float32)

    params = init_params(k_p, input_nc=2 * C_each, ndf=8, n_layers=3)

    out = n_layer_discriminator_forward(params, im, x)
    out = jax.block_until_ready(out)
    assert out.shape == (N, 1, 2, 2), out.shape
    assert bool(jnp.all(jnp.isfinite(out)))

    feats = n_layer_discriminator_forward(params, im, x, requires_features=True)
    jax.block_until_ready(feats[-1])
    assert len(feats) == 5
    assert feats[0].shape == (N, 8, 16, 16)
    assert feats[-1].shape == (N, 1, 2, 2)

    print("KERNEL_OK")
</pallas_src>

<mosaic_0001>
module attributes {stable_mosaic.version = 11 : i64} {
  func.func @_conv_act_kernel(%arg0: i32, %arg1: memref<256x128xbf16, #tpu.memory_space<vmem>>, %arg2: memref<128x8xbf16, #tpu.memory_space<vmem>>, %arg3: memref<1x8xf32, #tpu.memory_space<vmem>>, %arg4: memref<256x8xbf16, #tpu.memory_space<vmem>>) attributes {dimension_semantics = [#tpu.dimension_semantics<parallel>], iteration_bounds = array<i64: 2>, scalar_prefetch = 0 : i64, scratch_operands = 0 : i64, tpu.core_type = #tpu.core_type<tc>, window_params = [{transform_indices = @transform_0, window_bounds = array<i64: 256, 128>}, {pipeline_mode = #tpu.pipeline_mode<synchronous>, transform_indices = @transform_1, window_bounds = array<i64: 128, 8>}, {pipeline_mode = #tpu.pipeline_mode<synchronous>, transform_indices = @transform_2, window_bounds = array<i64: 1, 8>}, {transform_indices = @transform_3, window_bounds = array<i64: 256, 8>}]} {
    %c0 = arith.constant 0 : index
    %c0_0 = arith.constant 0 : index
    %0 = vector.load %arg1[%c0, %c0_0] : memref<256x128xbf16, #tpu.memory_space<vmem>>, vector<256x128xbf16>
    %c0_1 = arith.constant 0 : index
    %c0_2 = arith.constant 0 : index
    %1 = vector.load %arg2[%c0_1, %c0_2] : memref<128x8xbf16, #tpu.memory_space<vmem>>, vector<128x8xbf16>
    %cst = arith.constant dense<0.000000e+00> : vector<256x8xf32>
    %2 = tpu.matmul %0, %1, %cst {dimension_numbers = #tpu.dot_dimension_numbers<[1], [0], [0], [1], [0, 0, 1, 1], [], []>} : vector<256x128xbf16>, vector<128x8xbf16>, vector<256x8xf32> -> vector<256x8xf32>
    %c0_3 = arith.constant 0 : index
    %c0_4 = arith.constant 0 : index
    %3 = vector.load %arg3[%c0_3, %c0_4] : memref<1x8xf32, #tpu.memory_space<vmem>>, vector<1x8xf32>
    %4 = vector.broadcast %3 : vector<1x8xf32> to vector<256x8xf32>
    %5 = arith.addf %2, %4 : vector<256x8xf32>
    %cst_5 = arith.constant 0.000000e+00 : f32
    %6 = vector.broadcast %cst_5 : f32 to vector<256x8xf32>
    %7 = arith.cmpf oge, %5, %6 : vector<256x8xf32>
    %cst_6 = arith.constant 2.000000e-01 : f32
    %8 = vector.broadcast %cst_6 : f32 to vector<256x8xf32>
    %9 = arith.mulf %8, %5 : vector<256x8xf32>
    %10 = arith.select %7, %5, %9 : vector<256x8xi1>, vector<256x8xf32>
    %11 = arith.truncf %10 : vector<256x8xf32> to vector<256x8xbf16>
    %c0_7 = arith.constant 0 : index
    %c0_8 = arith.constant 0 : index
    %12 = vector.load %arg4[%c0_7, %c0_8] : memref<256x8xbf16, #tpu.memory_space<vmem>>, vector<256x8xbf16>
    tpu.vector_store %arg4[%c0_7, %c0_8], %11 {strides = array<i32>} : memref<256x8xbf16, #tpu.memory_space<vmem>>, vector<256x8xbf16>,
    return
  }
  func.func @transform_0(%arg0: i32) -> (i32, i32) {
    %c0_i32 = arith.constant 0 : i32
    %c0_i32_0 = arith.constant 0 : i32
    return %arg0, %c0_i32 : i32, i32
  }
  func.func @transform_1(%arg0: i32) -> (i32, i32) {
    %c0_i32 = arith.constant 0 : i32
    %c0_i32_0 = arith.constant 0 : i32
    %c0_i32_1 = arith.constant 0 : i32
    return %c0_i32, %c0_i32_0 : i32, i32
  }
  func.func @transform_2(%arg0: i32) -> (i32, i32) {
    %c0_i32 = arith.constant 0 : i32
    %c0_i32_0 = arith.constant 0 : i32
    %c0_i32_1 = arith.constant 0 : i32
    return %c0_i32, %c0_i32_0 : i32, i32
  }
  func.func @transform_3(%arg0: i32) -> (i32, i32) {
    %c0_i32 = arith.constant 0 : i32
    %c0_i32_0 = arith.constant 0 : i32
    return %arg0, %c0_i32 : i32, i32
  }
}

</mosaic_0001>

<bundles_post_ra>
// kernel: tpu_custom_call.1
= control target key start
LH: loop header
LB: loop body
LE: loop exit
PB: predicated region body
PF: predicated region fallthrough
CT: control target
= control target key end

     0   :  { %8 = vsyncpa [#allocation3], 0  ;;  %s1476_s0 = inlined_call_operand.hbm [shape: bf16[512,128], index: 0, kind: input, shape index: {}]   ;;  %s1477_s1 = inlined_call_operand.vmem [shape: bf16[128,8], index: 1, kind: input, shape index: {}]   ;;  %s1478_s2 = inlined_call_operand.vmem [shape: f32[1,8], index: 2, kind: input, shape index: {}]   ;;  %s1479_s3 = inlined_call_operand.vmem [shape: bf16[512,8], index: 3, kind: output, shape index: {}]  }
   0x1   :  { %10 = vsyncpa [#allocation3 + $0x1], 0  ;;  %s1223_s12 = smov 0   ;;  %s1225_s13 = smov 0  }
   0x2   :  { %s1227_s14 = smov 0   ;;  %s1229_s15 = smov 0  }
   0x3 LB: > { %s878_s16 = sadd.s32 4294967295, %s1198_s15   ;;  %s1243_s17 = sadd.s32 1, %s1198_s15   ;;  %s1198_s15 = sphi %s1229_s15, %s1486_s15   ;;  %s1194_s14 = sphi %s1227_s14, %s1485_s14   ;;  %s1190_s13 = sphi %s1225_s13, %s1484_s13   ;;  %s1186_s12 = sphi %s1223_s12, %s1483_s12  }
   0x4   : > { %s20_s18 = ssub.s32 %s1198_s15, %s1243_s17  ;;  %s23_s19 = sadd.s32 1, %s1194_s14 }
   0x5   : > { %p21_p0 = scmp.eq.s32.totalorder %s20_s18, 0  ;;  %p30_p1 = scmp.ne.s32.totalorder %s1194_s14, %s1190_s13 }
   0x6   : > { %p31_p2 = scmp.eq.s32.totalorder %s1198_s15, 0  ;;  %p36_p3 = scmp.ne.s32.totalorder %s1190_s13, %s1186_s12 }
   0x7   : > { %s1253_s20 = scalar_select %p21_p0, %s1194_s14, %s23_s19  }
   0x8   : > { %p32_p4 = por %p31_p2, %p30_p1  ;;  %p37_p5 = scmp.eq.s32.totalorder %s878_s16, 0 }
   0x9   : > { %p1075_p6 = scmp.lt.s32.totalorder %s1198_s15, 2  ;;  %s134_s22 = sand.u32 1, %s1194_s14  }
   0xa   : > { %p1258_p7 = por %p37_p5, %p36_p3  ;;  %s882_s23 = sshll.u32 %s134_s22, 7 }
   0xb   : > { %s948_s24 = sshll.u32 %s1198_s15, 11  ;;  %s138_s28 = scalar_lea.vmem [#allocation2], %s882_s23 }
   0xc   : > { %s1267_s27 = scalar_lea.hbm %s1476_s0, %s948_s24  ;;  %s145_s29 = sshll.u32 %s138_s28, 4  ;;  %s1269_s29 = int_to_ptr.vmem [resolvable:$true] %s145_s29 }
   0xd   : > { %p1271_p8 = pnand %p1075_p6, %p32_p4  ;;  %s1276_s4 = scalar_lea.sflag [#allocation3], %s134_s22 }
   0xe   : > { %s1134_s5 = scalar_lea.hbm %s1267_s27, 2048  ;;  %s1139_s8 = scalar_lea.hbm %s1476_s0, 4096 }
   0xf   : > { %p1135_p10 = scmp.ne.s32.totalorder %s1267_s27, %s1134_s5  ;;  %p1136_p11 = pneg %p1271_p8 }
  0x10   : > { %p1140_p0 = scmp.lt.u32.totalorder %s1267_s27, %s1476_s0  ;;  %p1141_p1 = scmp.lt.u32.totalorder %s1139_s8, %s1134_s5 }
  0x11   : > { %p1137_p12 = pnand %p1136_p11, %p1135_p10  ;;  %p1143_p3 = scmp.lt.u32.totalorder %s1134_s5, %s1267_s27 }
  0x12   : > { %p1142_p2 = por %p1141_p1, %p1140_p0 }
  0x13   : > { %p1138_p13 = pneg %p1137_p12 }
  0x14   : > { %p1144_p4 = por %p1143_p3, %p1142_p2 }
  0x16   : > { %p1145_p5 = pnand %p1144_p4, %p1138_p13 }
  0x18   : > { %1148 = shalt.err (!%p1145_p5)
}
  0x19   : > { %s1149_s11 = scalar_lea.vmem %s1269_s29, 2048  ;;  %s1200_s12 = smov [#allocation2]  }
  0x1a   : > { %p1150_p6 = scmp.ne.s32.totalorder %s1269_s29, %s1149_s11  ;;  %s1154_s18 = sshll.u32 %s1200_s12, 4  ;;  %s1155_s18 = int_to_ptr.vmem [resolvable:$false] %s1154_s18 }
  0x1b   : > { %s1156_s19 = scalar_lea.vmem %s1155_s18, 4096  ;;  %p1157_p9 = scmp.lt.s32.totalorder %s1269_s29, %s1155_s18 }
  0x1c   : > { %p1152_p10 = pnand %p1150_p6, %p1136_p11  ;;  %p1158_p0 = scmp.lt.s32.totalorder %s1156_s19, %s1149_s11 }
  0x1e   : > { %p1153_p12 = pneg %p1152_p10  ;;  %p1159_p1 = por %p1158_p0, %p1157_p9 }
  0x20   : > { %p1160_p2 = pnand %p1159_p1, %p1153_p12 }
  0x22   : > { %1163 = shalt.err (!%p1160_p2)
}
  0x23   : > { %s1201_s22 = smov 64   ;;  %s1202_s23 = smov 4  }
  0x24   : > { %1074 = dma.hbm_to_vmem [thread:$0]  (!%p1271_p8), %s1267_s27, 2048, %s1269_s29, %s1276_s4, %s1201_s22, %s1201_s22, %s1202_s23  }
  0x25   : > { %p153_p11 = scmp.lt.s32.totalorder %s1198_s15, 3  ;;  %p1482_p13 = scmp.ge.s32.totalorder %s1198_s15, 1 }
  0x27   : > { %p154_p3 = pnand %p1482_p13, %p153_p11 }
  0x28   : > { %s159_s24 = sand.u32 (!%p154_p3), 1, %s1190_s13  }
  0x29   : > { %157 = sbr.rel (%p154_p3) target bundleno = 340 (0x154), region = 32  ;;  %s886_s25 = sshll.u32 (!%p154_p3), %s159_s24, 7 }
  0x2a   : > { %s160_s26 = scalar_lea.sflag (!%p154_p3), [#allocation3], %s159_s24  ;;  %s1308_s28 = scalar_lea.vmem (!%p154_p3), [#allocation2], %s886_s25 }
  0x30   : > { %1181 = dma.done.wait (%p1258_p7), %s160_s26, 2048  }
  0x31   : > { %1183 = vsyncadd (%p1258_p7), %s160_s26, 4294965248  ;;  %v1110_v0 = vld [vmem:[%s1477_s1] sm:$0xff]   ;;  %v1111_v1 = vld [vmem:[%s1477_s1 + $0x8] sm:$0xff]   ;;  %s887_s23 = sshll.u32 %s878_s16, 5  ;;  %vm778_vm0 = vcmask 60416  }
  0x32   : > { %1005 = vmatprep.subr.bf16.mxu0 %v1110_v0  ;;  %1053 = vmatprep.subr.bf16.mxu1 %v1110_v0  ;;  %v1112_v2 = vld [vmem:[%s1477_s1 + $0x10] sm:$0xff]   ;;  %v1113_v3 = vld [vmem:[%s1477_s1 + $0x18] sm:$0xff]   ;;  %v1118_v4 = vld [vmem:[%s1308_s28] sm:$0xff]   ;;  %p188_p7 = scmp.lt.s32.totalorder %s887_s23, 63 }
  0x33   : > { %1006 = vmatpush3.bf16.msra.mxu0 %v1110_v0  ;;  %1061 = vmatpush3.bf16.msra.mxu1 %v1110_v0  ;;  %v1119_v5 = vld [vmem:[%s1308_s28 + $0x40] sm:$0xff]   ;;  %v1115_v7 = vld [vmem:[%s1477_s1 + $0x28] sm:$0xff]   ;;  %v1116_v8 = vld [vmem:[%s1477_s1 + $0x30] sm:$0xff]  }
  0x34   : > { %1007 = vmatprep.subr.bf16.mxu0 %v1111_v1  ;;  %1054 = vmatprep.subr.bf16.mxu1 %v1111_v1  ;;  %v1114_v6 = vld [vmem:[%s1477_s1 + $0x20] sm:$0xff]   ;;  %v1117_v9 = vld [vmem:[%s1477_s1 + $0x38] sm:$0xff]   ;;  %v1120_v10 = vld [vmem:[%s1308_s28 + $0x8] sm:$0xff]   ;;  %s1488_s23 = smov (!%p188_p7, %s887_s23), 63 }
  0x35   : > { %1021 = vmatprep.mubr.bf16.mxu0 %v1118_v4  ;;  %1037 = vmatprep.mubr.bf16.mxu1 %v1119_v5  ;;  %v1121_v11 = vld [vmem:[%s1308_s28 + $0x48] sm:$0xff]   ;;  %v1122_v12 = vld [vmem:[%s1308_s28 + $0x10] sm:$0xff]   ;;  %v1124_v14 = vld [vmem:[%s1308_s28 + $0x18] sm:$0xff]   ;;  %s888_s26 = sshll.u32 %s1488_s23, 2 }
  0x36   : > { %v1123_v13 = vld [vmem:[%s1308_s28 + $0x50] sm:$0xff]   ;;  %v1125_v15 = vld [vmem:[%s1308_s28 + $0x58] sm:$0xff]   ;;  %v1126_v16 = vld [vmem:[%s1308_s28 + $0x20] sm:$0xff]  }
  0x37   : > { %1008 = vmatpush3.bf16.msra.mxu0 %v1111_v1  ;;  %1062 = vmatpush3.bf16.msra.mxu1 %v1111_v1  ;;  %v1127_v17 = vld [vmem:[%s1308_s28 + $0x60] sm:$0xff]   ;;  %v1128_v18 = vld [vmem:[%s1308_s28 + $0x28] sm:$0xff]   ;;  %v1130_v20 = vld [vmem:[%s1308_s28 + $0x30] sm:$0xff]  }
  0x38   : > { %1009 = vmatprep.subr.bf16.mxu0 %v1112_v2  ;;  %1055 = vmatprep.subr.bf16.mxu1 %v1112_v2  ;;  %v1129_v19 = vld [vmem:[%s1308_s28 + $0x68] sm:$0xff]   ;;  %v1131_v21 = vld [vmem:[%s1308_s28 + $0x70] sm:$0xff]   ;;  %v1132_v22 = vld [vmem:[%s1308_s28 + $0x38] sm:$0xff]  }
  0x39   : > { %v1133_v23 = vld [vmem:[%s1308_s28 + $0x78] sm:$0xff]   ;;  %v1359_v24 = vld [vmem:[%s1478_s2] ss:$0 sm:$0xff]  ;;  %s1368_s28 = scalar_lea.vmem %s1479_s3, %s888_s26 }
  0x3b   : > { %1010 = vmatpush3.bf16.msra.mxu0 %v1112_v2  ;;  %1063 = vmatpush3.bf16.msra.mxu1 %v1112_v2 }
  0x3c   : > { %1011 = vmatprep.subr.bf16.mxu0 %v1113_v3  ;;  %1056 = vmatprep.subr.bf16.mxu1 %v1113_v3 }
  0x3f   : > { %1012 = vmatpush3.bf16.msra.mxu0 %v1113_v3  ;;  %1064 = vmatpush3.bf16.msra.mxu1 %v1113_v3 }
  0x40   : > { %1013 = vmatprep.subr.bf16.mxu0 %v1114_v6  ;;  %1057 = vmatprep.subr.bf16.mxu1 %v1114_v6 }
  0x43   : > { %1014 = vmatpush3.bf16.msra.mxu0 %v1114_v6  ;;  %1065 = vmatpush3.bf16.msra.mxu1 %v1114_v6 }
  0x44   : > { %1015 = vmatprep.subr.bf16.mxu0 %v1115_v7  ;;  %1058 = vmatprep.subr.bf16.mxu1 %v1115_v7 }
  0x47   : > { %1016 = vmatpush3.bf16.msra.mxu0 %v1115_v7  ;;  %1066 = vmatpush3.bf16.msra.mxu1 %v1115_v7 }
  0x48   : > { %1017 = vmatprep.subr.bf16.mxu0 %v1116_v8  ;;  %1059 = vmatprep.subr.bf16.mxu1 %v1116_v8 }
  0x4b   : > { %1018 = vmatpush3.bf16.msra.mxu0 %v1116_v8  ;;  %1067 = vmatpush3.bf16.msra.mxu1 %v1116_v8 }
  0x4c   : > { %1019 = vmatprep.subr.bf16.mxu0 %v1117_v9  ;;  %1060 = vmatprep.subr.bf16.mxu1 %v1117_v9 }
  0x4f   : > { %1020 = vmatpush3.bf16.msra.mxu0 %v1117_v9  ;;  %1068 = vmatpush3.bf16.msra.mxu1 %v1117_v9 }
  0x52   : > { %1022 = vmatmul.mubr.bf16.vlgmr.msra.gmra.mrb[0].mxu0 %v1120_v10  ;;  %1038 = vmatmul.mubr.bf16.vlgmr.msra.gmra.mrb[0].mxu1 %v1121_v11 }
  0x53   : > { %1025 = vmatprep.mubr.bf16.mxu0 %v1122_v12  ;;  %1041 = vmatprep.mubr.bf16.mxu1 %v1123_v13 }
  0x5a   : > { %1026 = vmatmul.mubr.bf16.gmra.mrb[4].mxu0 %v1124_v14  ;;  %1042 = vmatmul.mubr.bf16.gmra.mrb[4].mxu1 %v1125_v15 }
  0x5b   : > { %1029 = vmatprep.mubr.bf16.mxu0 %v1126_v16  ;;  %1045 = vmatprep.mubr.bf16.mxu1 %v1127_v17 }
  0x62   : > { %1030 = vmatmul.mubr.bf16.gmra.mrb[8].mxu0 %v1128_v18  ;;  %1046 = vmatmul.mubr.bf16.gmra.mrb[8].mxu1 %v1129_v19 }
  0x63   : > { %1033 = vmatprep.mubr.bf16.mxu0 %v1130_v20  ;;  %1049 = vmatprep.mubr.bf16.mxu1 %v1131_v21 }
  0x6a   : > { %1034 = vmatmul.mubr.bf16.gmra.mrb[12].mxu0 %v1132_v22  ;;  %1050 = vmatmul.mubr.bf16.gmra.mrb[12].mxu1 %v1133_v23 }
 0x125   : > { %v1023_v25 = vpop.f32.mrb[0].mxu0  ;;  %v1039_v26 = vpop.f32.mrb[0].mxu1 }
 0x126   : > { %v436_v27 = vadd.f32 %v1023_v25, %v1359_v24  ;;  %v500_v28 = vadd.f32 %v1039_v26, %v1359_v24  ;;  %v427_v29 = vpop.f32.mrb[1].mxu0  ;;  %v491_v30 = vpop.f32.mrb[1].mxu1 }
 0x127   : > { %v428_v31 = vadd.f32 %v1359_v24, %v427_v29  ;;  %v492_v32 = vadd.f32 %v1359_v24, %v491_v30  ;;  %v1024_v33 = vpop.f32.mrb[2].mxu0  ;;  %v1040_v34 = vpop.f32.mrb[2].mxu1 }
 0x128   : > { %vm556_vm1 = vcmp.ge.f32.partialorder %v436_v27, 0.0  ;;  %v588_v35 = vmul.f32 0.2, %v436_v27  ;;  %vm572_vm2 = vcmp.ge.f32.partialorder %v500_v28, 0.0  ;;  %v604_v36 = vmul.f32 0.2, %v500_v28 }
 0x129   : > { %vm554_vm3 = vcmp.ge.f32.partialorder %v428_v31, 0.0  ;;  %v586_v37 = vmul.f32 0.2, %v428_v31  ;;  %vm570_vm4 = vcmp.ge.f32.partialorder %v492_v32, 0.0  ;;  %v602_v38 = vmul.f32 0.2, %v492_v32 }
 0x12a   : > { %v620_v39 = vsel %vm556_vm1, %v436_v27, %v588_v35  ;;  %v636_v40 = vsel %vm572_vm2, %v500_v28, %v604_v36  ;;  %v439_v41 = vadd.f32 %v1024_v33, %v1359_v24  ;;  %v503_v42 = vadd.f32 %v1040_v34, %v1359_v24  ;;  %v430_v43 = vpop.f32.mrb[3].mxu0  ;;  %v494_v44 = vpop.f32.mrb[3].mxu1 }
 0x12b   : > { %v951_v45 = vpack.c.bf16 %v620_v39, %v620_v39  ;;  %v967_v46 = vpack.c.bf16 %v636_v40, %v636_v40  ;;  %v618_v47 = vsel %vm554_vm3, %v428_v31, %v586_v37  ;;  %v634_v48 = vsel %vm570_vm4, %v492_v32, %v602_v38 }
 0x12c   : > { %v949_v49 = vpack.c.bf16 %v618_v47, %v618_v47  ;;  %v965_v50 = vpack.c.bf16 %v634_v48, %v634_v48  ;;  %vm557_vm5 = vcmp.ge.f32.partialorder %v439_v41, 0.0  ;;  %v589_v51 = vmul.f32 0.2, %v439_v41 }
 0x12d   : > { %781 = vst.msk [vmem:[%s1368_s28 + $0x8] sm:$0xf] %vm778_vm0, %v951_v45  ;;  %797 = vst.msk [vmem:[%s1368_s28 + $0x48] sm:$0xf] %vm778_vm0, %v967_v46  ;;  %vm573_vm6 = vcmp.ge.f32.partialorder %v503_v42, 0.0  ;;  %v431_v53 = vadd.f32 %v1359_v24, %v430_v43  ;;  %v495_v54 = vadd.f32 %v1359_v24, %v494_v44  ;;  %v1027_v55 = vpop.f32.mrb[4].mxu0 }
 0x12e   : > { %v605_v52 = vmul.f32 0.2, %v503_v42  ;;  %v1043_v56 = vpop.f32.mrb[4].mxu1  ;;  %779 = vst.msk [vmem:[%s1368_s28] sm:$0xf] %vm778_vm0, %v949_v49  ;;  %v621_v57 = vsel %vm557_vm5, %v439_v41, %v589_v51  ;;  %v452_v58 = vadd.f32 %v1027_v55, %v1359_v24  ;;  %v443_v60 = vpop.f32.mrb[5].mxu0 }
 0x12f   : > { %795 = vst.msk [vmem:[%s1368_s28 + $0x40] sm:$0xf] %vm778_vm0, %v965_v50  ;;  %v516_v59 = vadd.f32 %v1043_v56, %v1359_v24  ;;  %v507_v61 = vpop.f32.mrb[5].mxu1  ;;  %v952_v62 = vpack.c.bf16 %v621_v57, %v621_v57  ;;  %vm555_vm7 = vcmp.ge.f32.partialorder %v431_v53, 0.0  ;;  %v587_v0 = vmul.f32 0.2, %v431_v53 }
 0x130   : > { %v637_v63 = vsel %vm573_vm6, %v503_v42, %v605_v52  ;;  %v1028_v1 = vpop.f32.mrb[6].mxu0  ;;  %v1044_v2 = vpop.f32.mrb[6].mxu1  ;;  %vm571_vm8 = vcmp.ge.f32.partialorder %v495_v54, 0.0  ;;  %v603_v4 = vmul.f32 0.2, %v495_v54  ;;  %vm560_vm9 = vcmp.ge.f32.partialorder %v452_v58, 0.0 }
 0x131   : > { %v968_v3 = vpack.c.bf16 %v637_v63, %v637_v63  ;;  %v446_v5 = vpop.f32.mrb[7].mxu0  ;;  %v510_v6 = vpop.f32.mrb[7].mxu1  ;;  %782 = vst.msk [vmem:[%s1368_s28 + $0xc] sm:$0xf] %vm778_vm0, %v952_v62  ;;  %v619_v7 = vsel %vm555_vm7, %v431_v53, %v587_v0  ;;  %v592_v8 = vmul.f32 0.2, %v452_v58  ;;  %v444_v12 = vadd.f32 %v1359_v24, %v443_v60 }
 0x132   : > { %vm576_vm10 = vcmp.ge.f32.partialorder %v516_v59, 0.0  ;;  %v608_v9 = vmul.f32 0.2, %v516_v59  ;;  %v950_v10 = vpack.c.bf16 %v619_v7, %v619_v7  ;;  %v635_v11 = vsel %vm571_vm8, %v495_v54, %v603_v4 }
 0x133   : > { %798 = vst.msk [vmem:[%s1368_s28 + $0x4c] sm:$0xf] %vm778_vm0, %v968_v3  ;;  %v508_v13 = vadd.f32 %v1359_v24, %v507_v61  ;;  %v966_v14 = vpack.c.bf16 %v635_v11, %v635_v11  ;;  %v624_v15 = vsel %vm560_vm9, %v452_v58, %v592_v8  ;;  %v455_v17 = vadd.f32 %v1028_v1, %v1359_v24 }
 0x134   : > { %v640_v16 = vsel %vm576_vm10, %v516_v59, %v608_v9  ;;  %780 = vst.msk [vmem:[%s1368_s28 + $0x4] sm:$0xf] %vm778_vm0, %v950_v10  ;;  %v955_v18 = vpack.c.bf16 %v624_v15, %v624_v15  ;;  %vm558_vm11 = vcmp.ge.f32.partialorder %v444_v12, 0.0  ;;  %v590_v20 = vmul.f32 0.2, %v444_v12 }
 0x135   : > { %v971_v19 = vpack.c.bf16 %v640_v16, %v640_v16  ;;  %796 = vst.msk [vmem:[%s1368_s28 + $0x44] sm:$0xf] %vm778_vm0, %v966_v14  ;;  %vm574_vm12 = vcmp.ge.f32.partialorder %v508_v13, 0.0  ;;  %v606_v21 = vmul.f32 0.2, %v508_v13  ;;  %vm561_vm13 = vcmp.ge.f32.partialorder %v455_v17, 0.0 }
 0x136   : > { %v593_v22 = vmul.f32 0.2, %v455_v17  ;;  %785 = vst.msk [vmem:[%s1368_s28 + $0x18] sm:$0xf] %vm778_vm0, %v955_v18  ;;  %v622_v23 = vsel %vm558_vm11, %v444_v12, %v590_v20  ;;  %v519_v25 = vadd.f32 %v1044_v2, %v1359_v24  ;;  %v447_v26 = vadd.f32 %v1359_v24, %v446_v5  ;;  %v1031_v28 = vpop.f32.mrb[8].mxu0  ;;  %v1047_v29 = vpop.f32.mrb[8].mxu1 }
 0x137   : > { %801 = vst.msk [vmem:[%s1368_s28 + $0x58] sm:$0xf] %vm778_vm0, %v971_v19  ;;  %v511_v27 = vadd.f32 %v1359_v24, %v510_v6  ;;  %v953_v30 = vpack.c.bf16 %v622_v23, %v622_v23  ;;  %v638_v31 = vsel %vm574_vm12, %v508_v13, %v606_v21  ;;  %v468_v33 = vadd.f32 %v1031_v28, %v1359_v24  ;;  %v459_v34 = vpop.f32.mrb[9].mxu0  ;;  %v523_v35 = vpop.f32.mrb[9].mxu1 }
 0x138   : > { %v625_v32 = vsel %vm561_vm13, %v455_v17, %v593_v22  ;;  %v969_v36 = vpack.c.bf16 %v638_v31, %v638_v31  ;;  %vm577_vm14 = vcmp.ge.f32.partialorder %v519_v25, 0.0  ;;  %v609_v38 = vmul.f32 0.2, %v519_v25  ;;  %v1032_v39 = vpop.f32.mrb[10].mxu0  ;;  %v1048_v40 = vpop.f32.mrb[10].mxu1 }
 0x139   : > { %v956_v37 = vpack.c.bf16 %v625_v32, %v625_v32  ;;  %783 = vst.msk [vmem:[%s1368_s28 + $0x10] sm:$0xf] %vm778_vm0, %v953_v30  ;;  %vm559_vm15 = vcmp.ge.f32.partialorder %v447_v26, 0.0  ;;  %v591_v41 = vmul.f32 0.2, %v447_v26  ;;  %vm575_vm1 = vcmp.ge.f32.partialorder %v511_v27, 0.0 }
 0x13a   : > { %v607_v42 = vmul.f32 0.2, %v511_v27  ;;  %799 = vst.msk [vmem:[%s1368_s28 + $0x50] sm:$0xf] %vm778_vm0, %v969_v36  ;;  %v641_v43 = vsel %vm577_vm14, %v519_v25, %v609_v38  ;;  %vm564_vm2 = vcmp.ge.f32.partialorder %v468_v33, 0.0  ;;  %v532_v45 = vadd.f32 %v1047_v29, %v1359_v24  ;;  %v462_v46 = vpop.f32.mrb[11].mxu0 }
 0x13b   : > { %786 = vst.msk [vmem:[%s1368_s28 + $0x1c] sm:$0xf] %vm778_vm0, %v956_v37  ;;  %v596_v44 = vmul.f32 0.2, %v468_v33  ;;  %v526_v47 = vpop.f32.mrb[11].mxu1  ;;  %v972_v48 = vpack.c.bf16 %v641_v43, %v641_v43  ;;  %v623_v49 = vsel %vm559_vm15, %v447_v26, %v591_v41  ;;  %v460_v51 = vadd.f32 %v1359_v24, %v459_v34 }
 0x13c   : > { %v639_v50 = vsel %vm575_vm1, %v511_v27, %v607_v42  ;;  %v954_v52 = vpack.c.bf16 %v623_v49, %v623_v49  ;;  %vm580_vm3 = vcmp.ge.f32.partialorder %v532_v45, 0.0  ;;  %v612_v56 = vmul.f32 0.2, %v532_v45 }
 0x13d   : > { %v970_v53 = vpack.c.bf16 %v639_v50, %v639_v50  ;;  %v628_v54 = vsel %vm564_vm2, %v468_v33, %v596_v44  ;;  %802 = vst.msk [vmem:[%s1368_s28 + $0x5c] sm:$0xf] %vm778_vm0, %v972_v48  ;;  %vm562_vm4 = vcmp.ge.f32.partialorder %v460_v51, 0.0  ;;  %v594_v57 = vmul.f32 0.2, %v460_v51  ;;  %v1035_v58 = vpop.f32.mrb[12].mxu0 }
 0x13e   : > { %v959_v55 = vpack.c.bf16 %v628_v54, %v628_v54  ;;  %784 = vst.msk [vmem:[%s1368_s28 + $0x14] sm:$0xf] %vm778_vm0, %v954_v52  ;;  %v524_v59 = vadd.f32 %v1359_v24, %v523_v35  ;;  %v471_v60 = vadd.f32 %v1032_v39, %v1359_v24  ;;  %v535_v61 = vadd.f32 %v1048_v40, %v1359_v24  ;;  %v1051_v63 = vpop.f32.mrb[12].mxu1  ;;  %v475_v0 = vpop.f32.mrb[13].mxu0 }
 0x13f   : > { %800 = vst.msk [vmem:[%s1368_s28 + $0x54] sm:$0xf] %vm778_vm0, %v970_v53  ;;  %v463_v62 = vadd.f32 %v1359_v24, %v462_v46  ;;  %v644_v1 = vsel %vm580_vm3, %v532_v45, %v612_v56  ;;  %v626_v2 = vsel %vm562_vm4, %v460_v51, %v594_v57  ;;  %v527_v3 = vadd.f32 %v1359_v24, %v526_v47  ;;  %v539_v5 = vpop.f32.mrb[13].mxu1  ;;  %v1036_v6 = vpop.f32.mrb[14].mxu0 }
 0x140   : > { %789 = vst.msk [vmem:[%s1368_s28 + $0x28] sm:$0xf] %vm778_vm0, %v959_v55  ;;  %v484_v4 = vadd.f32 %v1035_v58, %v1359_v24  ;;  %v975_v7 = vpack.c.bf16 %v644_v1, %v644_v1  ;;  %v957_v8 = vpack.c.bf16 %v626_v2, %v626_v2  ;;  %vm578_vm5 = vcmp.ge.f32.partialorder %v524_v59, 0.0  ;;  %v1052_v10 = vpop.f32.mrb[14].mxu1  ;;  %v478_v11 = vpop.f32.mrb[15].mxu0 }
 0x141   : > { %v610_v9 = vmul.f32 0.2, %v524_v59  ;;  %vm565_vm6 = vcmp.ge.f32.partialorder %v471_v60, 0.0  ;;  %v597_v12 = vmul.f32 0.2, %v471_v60  ;;  %vm581_vm7 = vcmp.ge.f32.partialorder %v535_v61, 0.0 }
 0x142   : > { %v613_v13 = vmul.f32 0.2, %v535_v61  ;;  %805 = vst.msk [vmem:[%s1368_s28 + $0x68] sm:$0xf] %vm778_vm0, %v975_v7  ;;  %787 = vst.msk [vmem:[%s1368_s28 + $0x20] sm:$0xf] %vm778_vm0, %v957_v8  ;;  %v548_v28 = vadd.f32 %v1051_v63, %v1359_v24  ;;  %v476_v30 = vadd.f32 %v1359_v24, %v475_v0  ;;  %v540_v31 = vadd.f32 %v1359_v24, %v539_v5 }
 0x143   : > { %v642_v14 = vsel %vm578_vm5, %v524_v59, %v610_v9  ;;  %vm563_vm8 = vcmp.ge.f32.partialorder %v463_v62, 0.0  ;;  %v595_v15 = vmul.f32 0.2, %v463_v62  ;;  %vm579_vm9 = vcmp.ge.f32.partialorder %v527_v3, 0.0  ;;  %v542_v16 = vpop.f32.mrb[15].mxu1 }
 0x144   : > { %v973_v17 = vpack.c.bf16 %v642_v14, %v642_v14  ;;  %v629_v18 = vsel %vm565_vm6, %v471_v60, %v597_v12  ;;  %v645_v19 = vsel %vm581_vm7, %v535_v61, %v613_v13  ;;  %v611_v20 = vmul.f32 0.2, %v527_v3 }
 0x145   : > { %v960_v21 = vpack.c.bf16 %v629_v18, %v629_v18  ;;  %v976_v22 = vpack.c.bf16 %v645_v19, %v645_v19  ;;  %v627_v23 = vsel %vm563_vm8, %v463_v62, %v595_v15  ;;  %vm568_vm10 = vcmp.ge.f32.partialorder %v484_v4, 0.0 }
 0x146   : > { %803 = vst.msk [vmem:[%s1368_s28 + $0x60] sm:$0xf] %vm778_vm0, %v973_v17  ;;  %v958_v25 = vpack.c.bf16 %v627_v23, %v627_v23  ;;  %v643_v26 = vsel %vm579_vm9, %v527_v3, %v611_v20  ;;  %v600_v27 = vmul.f32 0.2, %v484_v4  ;;  %v487_v32 = vadd.f32 %v1036_v6, %v1359_v24 }
 0x147   : > { %790 = vst.msk [vmem:[%s1368_s28 + $0x2c] sm:$0xf] %vm778_vm0, %v960_v21  ;;  %806 = vst.msk [vmem:[%s1368_s28 + $0x6c] sm:$0xf] %vm778_vm0, %v976_v22  ;;  %v974_v29 = vpack.c.bf16 %v643_v26, %v643_v26  ;;  %vm584_vm11 = vcmp.ge.f32.partialorder %v548_v28, 0.0  ;;  %v551_v35 = vadd.f32 %v1052_v10, %v1359_v24  ;;  %vm566_vm12 = vcmp.ge.f32.partialorder %v476_v30, 0.0 }
 0x148   : > { %788 = vst.msk [vmem:[%s1368_s28 + $0x24] sm:$0xf] %vm778_vm0, %v958_v25  ;;  %v632_v33 = vsel %vm568_vm10, %v484_v4, %v600_v27  ;;  %v616_v34 = vmul.f32 0.2, %v548_v28  ;;  %v598_v37 = vmul.f32 0.2, %v476_v30  ;;  %v479_v47 = vadd.f32 %v1359_v24, %v478_v11 }
 0x149   : > { %804 = vst.msk [vmem:[%s1368_s28 + $0x64] sm:$0xf] %vm778_vm0, %v974_v29  ;;  %v963_v36 = vpack.c.bf16 %v632_v33, %v632_v33  ;;  %vm582_vm13 = vcmp.ge.f32.partialorder %v540_v31, 0.0  ;;  %v614_v39 = vmul.f32 0.2, %v540_v31  ;;  %vm569_vm14 = vcmp.ge.f32.partialorder %v487_v32, 0.0 }
 0x14a   : > { %v648_v38 = vsel %vm584_vm11, %v548_v28, %v616_v34  ;;  %v601_v40 = vmul.f32 0.2, %v487_v32  ;;  %v630_v42 = vsel %vm566_vm12, %v476_v30, %v598_v37  ;;  %vm585_vm15 = vcmp.ge.f32.partialorder %v551_v35, 0.0 }
 0x14b   : > { %793 = vst.msk [vmem:[%s1368_s28 + $0x38] sm:$0xf] %vm778_vm0, %v963_v36  ;;  %v979_v41 = vpack.c.bf16 %v648_v38, %v648_v38  ;;  %v617_v43 = vmul.f32 0.2, %v551_v35  ;;  %v961_v44 = vpack.c.bf16 %v630_v42, %v630_v42  ;;  %v646_v45 = vsel %vm582_vm13, %v540_v31, %v614_v39 }
 0x14c   : > { %v633_v46 = vsel %vm569_vm14, %v487_v32, %v601_v40  ;;  %v977_v48 = vpack.c.bf16 %v646_v45, %v646_v45  ;;  %v543_v51 = vadd.f32 %v1359_v24, %v542_v16  ;;  %vm567_vm1 = vcmp.ge.f32.partialorder %v479_v47, 0.0 }
 0x14d   : > { %809 = vst.msk [vmem:[%s1368_s28 + $0x78] sm:$0xf] %vm778_vm0, %v979_v41  ;;  %v964_v49 = vpack.c.bf16 %v633_v46, %v633_v46  ;;  %v649_v50 = vsel %vm585_vm15, %v551_v35, %v617_v43  ;;  %791 = vst.msk [vmem:[%s1368_s28 + $0x30] sm:$0xf] %vm778_vm0, %v961_v44  ;;  %v599_v53 = vmul.f32 0.2, %v479_v47 }
 0x14e   : > { %v980_v52 = vpack.c.bf16 %v649_v50, %v649_v50  ;;  %807 = vst.msk [vmem:[%s1368_s28 + $0x70] sm:$0xf] %vm778_vm0, %v977_v48  ;;  %vm583_vm2 = vcmp.ge.f32.partialorder %v543_v51, 0.0  ;;  %v615_v54 = vmul.f32 0.2, %v543_v51 }
 0x14f   : > { %794 = vst.msk [vmem:[%s1368_s28 + $0x3c] sm:$0xf] %vm778_vm0, %v964_v49  ;;  %v631_v55 = vsel %vm567_vm1, %v479_v47, %v599_v53 }
 0x150   : > { %810 = vst.msk [vmem:[%s1368_s28 + $0x7c] sm:$0xf] %vm778_vm0, %v980_v52  ;;  %v962_v56 = vpack.c.bf16 %v631_v55, %v631_v55  ;;  %v647_v57 = vsel %vm583_vm2, %v543_v51, %v615_v54 }
 0x151   : > { %v978_v58 = vpack.c.bf16 %v647_v57, %v647_v57 }
 0x152   : > { %792 = vst.msk [vmem:[%s1368_s28 + $0x34] sm:$0xf] %vm778_vm0, %v962_v56 }
 0x153   : > { %808 = vst.msk [vmem:[%s1368_s28 + $0x74] sm:$0xf] %vm778_vm0, %v978_v58 }
 0x154 PF: > { %p13_p8 = scmp.ge.s32.totalorder %s1243_s17, 4   ;;  %s1483_s12 = smov %s1190_s13 }
 0x155   : > { %s1484_s13 = smov %s1194_s14  ;;  %s1485_s14 = smov %s1253_s20 }
 0x156   : > { %s1486_s15 = smov %s1243_s17  ;;  %15 = sbr.rel (!%p13_p8) target bundleno = 3 (0x3), region = 72 }
 0x15d   :  { %833 = vsyncpa [#allocation3], 1 }
 0x15e   :  { %835 = vsyncpa [#allocation3 + $0x1], 1 }

</bundles_post_ra>
